<compile_context>
chip_gen: v5e
topology: v5e:2x2
jax: 0.10.0
libtpu: 0.0.40
codegen_flags: <defaults>
</compile_context>

<pallas_src>
import functools

import jax
import jax.numpy as jnp
from jax.experimental import pallas as pl
from jax.experimental.pallas import tpu as pltpu


_NUM_PARTIALS = 2   # leading "parallel" grid axis -> one partial per TensorCore
_NUM_BUFFERS = 2    # BlockSpec double-buffering of the streamed n_score tile


def _cdiv(a, b):
    return -(-a // b)


def _round_up(x, m):
    return _cdiv(x, m) * m


def _vmem_capacity_bytes():
    try:
        return int(pltpu.get_tpu_info().vmem_capacity_bytes)
    except Exception:
        return 64 * 1024 * 1024   # conservative fallback (v7x per-TC VMEM)


def _log_sigmoid(x):
    # numerically stable logsigmoid(x) = min(x, 0) - log1p(exp(-|x|))
    return jnp.minimum(x, 0.0) - jnp.log1p(jnp.exp(-jnp.abs(x)))


def _fold_to_8(x, tile_rows):
    """(tile_rows, C) -> (8, C) by summing sublane groups (VALU-only, no XLU)."""
    if tile_rows == 8:
        return x
    return x.reshape(tile_rows // 8, 8, x.shape[-1]).sum(axis=0)


def _choose_tile_rows(rows, cols, itemsize, budget_bytes, n_split,
                      max_tile_rows=None):
    """Rows per grid step so the double-buffered input tile stays in budget."""
    per_row = max(1, cols * _NUM_BUFFERS * itemsize)
    tile = budget_bytes // per_row
    tile = max(8, (tile // 8) * 8)
    if max_tile_rows is not None:
        tile = min(tile, max(8, (max_tile_rows // 8) * 8))
    # Give each TensorCore partial its own tile(s) whenever there is enough work.
    tile = min(tile, max(8, _round_up(_cdiv(rows, n_split), 8)))
    tile = min(tile, _round_up(rows, 8))
    return tile


def _plain_kernel(n_ref, out_ref, acc_ref, *, tile_rows, tiles_per_core,
                  valid_rows, ragged):
    # Accumulates sum(logsigmoid(-n)) over this partial's tiles.
    c = pl.program_id(0)
    i = pl.program_id(1)

    @pl.when(i == 0)
    def _init():
        acc_ref[...] = jnp.zeros_like(acc_ref)

    if not ragged:
        n = n_ref[...].astype(jnp.float32)
        acc_ref[...] += _fold_to_8(_log_sigmoid(-n), tile_rows)
    else:
        rows_valid = valid_rows - (c * tiles_per_core + i) * tile_rows

        @pl.when(rows_valid >= tile_rows)          # full tile: no mask cost
        def _full():
            n = n_ref[...].astype(jnp.float32)
            acc_ref[...] += _fold_to_8(_log_sigmoid(-n), tile_rows)

        @pl.when(rows_valid < tile_rows)           # ragged / duplicated tail tile
        def _partial():
            n = n_ref[...].astype(jnp.float32)
            mask = jax.lax.broadcasted_iota(jnp.int32, n.shape, 0) < rows_valid
            n = jnp.where(mask, n, 0.0)            # keep garbage away from exp/log1p
            contrib = jnp.where(mask, _log_sigmoid(-n), 0.0)
            acc_ref[...] += _fold_to_8(contrib, tile_rows)

    @pl.when(i == tiles_per_core - 1)
    def _finalize():
        out_ref[...] = acc_ref[...].reshape(out_ref.shape)


def _adv_kernel(temp_ref, n_ref, out_ref, acc_ref, *, tile_rows, tiles_per_core,
                valid_rows, ragged):
    # Accumulates sum(softmax(n*T, -1) * logsigmoid(-n)) over this partial's tiles.
    c = pl.program_id(0)
    i = pl.program_id(1)

    @pl.when(i == 0)
    def _init():
        acc_ref[...] = jnp.zeros_like(acc_ref)

    t = temp_ref[0].astype(jnp.float32)            # SMEM scalar (prefetched)

    def weighted_logsig(n):
        logits = n * t
        m = jnp.max(logits, axis=-1, keepdims=True)
        e = jnp.exp(logits - m)
        denom = jnp.sum(e, axis=-1, keepdims=True)
        r = pl.reciprocal(denom, approx=True)      # EUP slot
        r = r * (2.0 - denom * r)                  # one Newton step -> ~f32-exact
        # softmax weights are detached in the reference; forward value identical.
        return (e * r) * _log_sigmoid(-n)

    if not ragged:
        n = n_ref[...].astype(jnp.float32)
        acc_ref[...] += _fold_to_8(weighted_logsig(n), tile_rows)
    else:
        rows_valid = valid_rows - (c * tiles_per_core + i) * tile_rows

        @pl.when(rows_valid >= tile_rows)
        def _full():
            n = n_ref[...].astype(jnp.float32)
            acc_ref[...] += _fold_to_8(weighted_logsig(n), tile_rows)

        @pl.when(rows_valid < tile_rows)
        def _partial():
            n = n_ref[...].astype(jnp.float32)
            mask = jax.lax.broadcasted_iota(jnp.int32, n.shape, 0) < rows_valid
            n = jnp.where(mask, n, 0.0)
            contrib = jnp.where(mask, weighted_logsig(n), 0.0)
            acc_ref[...] += _fold_to_8(contrib, tile_rows)

    @pl.when(i == tiles_per_core - 1)
    def _finalize():
        out_ref[...] = acc_ref[...].reshape(out_ref.shape)


def sigmoid_loss(p_score, n_score, adv_temperature=None, *, max_tile_rows=None):
    """Forward pass of SigmoidLoss; returns a scalar float32 loss."""
    p_score = jnp.asarray(p_score)     # keep native dtype; upcast in-kernel
    n_score = jnp.asarray(n_score)
    if n_score.ndim == 1:
        n_score = n_score[None, :]
    batch, n_cols = n_score.shape
    total_elems = batch * n_cols
    adv = adv_temperature is not None

    # O(B) positive-score term in plain JAX (tiny; trims kernel finalize + VMEM).
    lp_mean = jnp.mean(_log_sigmoid(p_score.astype(jnp.float32)))

    # Lane-densify the plain path: the flat mean is reshape-invariant, so pack
    # the last dim to a full-vreg multiple of 128 when N < 128.
    work = n_score
    if (not adv) and n_cols < 128 and total_elems % 128 == 0:
        work = n_score.reshape(-1, 128)
    rows, cols = work.shape
    itemsize = jnp.dtype(work.dtype).itemsize

    vmem_cap = _vmem_capacity_bytes()
    budget = min(vmem_cap // 2, 64 * 1024 * 1024)   # ~50% of VMEM for input bufs
    tile_rows = _choose_tile_rows(rows, cols, itemsize, budget,
                                  _NUM_PARTIALS, max_tile_rows)

    total_tiles = _cdiv(rows, tile_rows)
    n_part = min(_NUM_PARTIALS, total_tiles)
    tiles_per_core = _cdiv(total_tiles, n_part)
    ragged = (n_part * tiles_per_core != total_tiles) or (rows % tile_rows != 0)
    last_tile = total_tiles - 1

    def _n_block(c, i):
        # Clamp so a duplicated tail tile of the per-core split never indexes
        # past the array; its contribution is masked to zero in-kernel.
        return (jnp.minimum(c * tiles_per_core + i, last_tile), 0)

    needed = (_NUM_BUFFERS * tile_rows * cols * itemsize   # streamed input tiles
              + 8 * cols * 4                               # accumulator
              + 2 * 8 * cols * 4)                          # output block
    vmem_limit = max(32 * 1024 * 1024, needed + (4 << 20))
    vmem_limit = min(vmem_limit, int(vmem_cap * 0.9))

    cparams = pltpu.CompilerParams(
        dimension_semantics=("parallel", "arbitrary"),
        vmem_limit_bytes=vmem_limit)

    out_shape = jax.ShapeDtypeStruct((n_part, 8, cols), jnp.float32)
    scratch = [pltpu.VMEM((8, cols), jnp.float32)]
    grid = (n_part, tiles_per_core)

    # TODO(synk): sweep pipeline_mode=pl.Buffered(3) on the n_score spec for
    # f32 inputs once tile sizes are locked in (bf16 stays double-buffered).
    if adv:
        temp = jnp.asarray(adv_temperature, dtype=jnp.float32).reshape((1,))
        kernel = functools.partial(_adv_kernel, tile_rows=tile_rows,
                                   tiles_per_core=tiles_per_core,
                                   valid_rows=rows, ragged=ragged)
        grid_spec = pltpu.PrefetchScalarGridSpec(
            num_scalar_prefetch=1,              # temperature lands in SMEM
            grid=grid,
            in_specs=[pl.BlockSpec((tile_rows, cols),
                                   lambda c, i, t: _n_block(c, i))],
            out_specs=pl.BlockSpec((1, 8, cols), lambda c, i, t: (c, 0, 0)),
            scratch_shapes=scratch)
        partials = pl.pallas_call(kernel, out_shape=out_shape,
                                  grid_spec=grid_spec,
                                  compiler_params=cparams)(temp, work)
        n_term = jnp.sum(partials) / float(batch)
    else:
        kernel = functools.partial(_plain_kernel, tile_rows=tile_rows,
                                   tiles_per_core=tiles_per_core,
                                   valid_rows=rows, ragged=ragged)
        grid_spec = pltpu.PrefetchScalarGridSpec(
            num_scalar_prefetch=0,
            grid=grid,
            in_specs=[pl.BlockSpec((tile_rows, cols),
                                   lambda c, i: _n_block(c, i))],
            out_specs=pl.BlockSpec((1, 8, cols), lambda c, i: (c, 0, 0)),
            scratch_shapes=scratch)
        partials = pl.pallas_call(kernel, out_shape=out_shape,
                                  grid_spec=grid_spec,
                                  compiler_params=cparams)(work)
        n_term = jnp.sum(partials) / float(total_elems)

    return -(lp_mean + n_term) * 0.5


class SigmoidLoss:
    """JAX/Pallas port of the PyTorch SigmoidLoss module (forward pass only)."""

    def __init__(self, adv_temperature=None):
        if adv_temperature is not None:
            # deterministic, non-trainable parameter of shape (1,)
            self.adv_temperature = jnp.asarray([adv_temperature], dtype=jnp.float32)
            self.adv_flag = True
        else:
            self.adv_flag = False

    def get_weights(self, n_score):
        return jax.nn.softmax(jnp.asarray(n_score) * self.adv_temperature, axis=-1)

    def forward(self, p_score, n_score):
        temp = self.adv_temperature if self.adv_flag else None
        return sigmoid_loss(p_score, n_score, adv_temperature=temp)

    def predict(self, p_score, n_score):
        import numpy as np
        return np.asarray(self.forward(p_score, n_score))

    def __call__(self, p_score, n_score):
        return self.forward(p_score, n_score)


def _ref_loss(p, n, temp=None):
    ls = jax.nn.log_sigmoid
    p = jnp.asarray(p, jnp.float32)
    n = jnp.asarray(n, jnp.float32)
    if temp is None:
        return -(jnp.mean(ls(p)) + jnp.mean(ls(-n))) / 2.0
    w = jax.nn.softmax(n * temp, axis=-1)
    return -(jnp.mean(ls(p)) + jnp.mean(jnp.sum(w * ls(-n), axis=-1))) / 2.0


if __name__ == "__main__":
    key = jax.random.PRNGKey(0)

    def check(val, ref, tag):
        val = jax.block_until_ready(val)
        assert jnp.allclose(val, ref, rtol=1e-4, atol=1e-4), (tag, val, ref)

    # small cases matching the module's usage: p [B,1], n [B,N]
    for (B, N) in [(8, 16), (256, 64)]:
        key, kp, kn = jax.random.split(key, 3)
        p = jax.random.normal(kp, (B, 1), dtype=jnp.float32) * 2.0
        n = jax.random.normal(kn, (B, N), dtype=jnp.float32) * 2.0
        check(SigmoidLoss()(p, n), _ref_loss(p, n), f"plain B={B}")
        check(SigmoidLoss(adv_temperature=1.5)(p, n), _ref_loss(p, n, 1.5),
              f"adv B={B}")

    # ragged multi-tile path across both partials (forces grid > 1 and masking)
    key, kp, kn = jax.random.split(key, 3)
    B, N = 300, 64
    p = jax.random.normal(kp, (B, 1), dtype=jnp.float32) * 2.0
    n = jax.random.normal(kn, (B, N), dtype=jnp.float32) * 2.0
    check(sigmoid_loss(p, n, max_tile_rows=64), _ref_loss(p, n), "plain ragged")
    check(sigmoid_loss(p, n, adv_temperature=1.5, max_tile_rows=64),
          _ref_loss(p, n, 1.5), "adv ragged")

    print("KERNEL_OK")
</pallas_src>

<mosaic_0001>
module attributes {stable_mosaic.version = 11 : i64} {
  func.func @_plain_kernel(%arg0: i32, %arg1: i32, %arg2: memref<8x128xf32, #tpu.memory_space<vmem>>, %arg3: memref<1x8x128xf32, #tpu.memory_space<vmem>>, %arg4: memref<8x128xf32, #tpu.memory_space<vmem>>) attributes {dimension_semantics = [#tpu.dimension_semantics<parallel>, #tpu.dimension_semantics<arbitrary>], iteration_bounds = array<i64: 1, 1>, scalar_prefetch = 0 : i64, scratch_operands = 1 : i64, tpu.core_type = #tpu.core_type<tc>, window_params = [{transform_indices = @transform_0, window_bounds = array<i64: 8, 128>}, {transform_indices = @transform_1, window_bounds = array<i64: 1, 8, 128>}]} {
    %c0_i32 = arith.constant 0 : i32
    %0 = arith.cmpi eq, %arg1, %c0_i32 : i32
    %1 = arith.extui %0 : i1 to i32
    %c0_i32_0 = arith.constant 0 : i32
    %2 = arith.cmpi ne, %1, %c0_i32_0 : i32
    scf.if %2 {
      %cst = arith.constant 0.000000e+00 : f32
      %16 = vector.broadcast %cst : f32 to vector<8x128xf32>
      %c0 = arith.constant 0 : index
      %c0_8 = arith.constant 0 : index
      %17 = vector.load %arg4[%c0, %c0_8] : memref<8x128xf32, #tpu.memory_space<vmem>>, vector<8x128xf32>
      tpu.vector_store %arg4[%c0, %c0_8], %16 {strides = array<i32>} : memref<8x128xf32, #tpu.memory_space<vmem>>, vector<8x128xf32>,
    } else {
    }
    %c1_i32 = arith.constant 1 : i32
    %3 = arith.muli %arg0, %c1_i32 : i32
    %4 = arith.addi %3, %arg1 : i32
    %c8_i32 = arith.constant 8 : i32
    %5 = arith.muli %4, %c8_i32 : i32
    %c1_i32_1 = arith.constant 1 : i32
    %6 = arith.subi %c1_i32_1, %5 : i32
    %c8_i32_2 = arith.constant 8 : i32
    %7 = arith.cmpi sge, %6, %c8_i32_2 : i32
    %8 = arith.extui %7 : i1 to i32
    %c0_i32_3 = arith.constant 0 : i32
    %9 = arith.cmpi ne, %8, %c0_i32_3 : i32
    scf.if %9 {
      %c0 = arith.constant 0 : index
      %c0_8 = arith.constant 0 : index
      %16 = vector.load %arg2[%c0, %c0_8] : memref<8x128xf32, #tpu.memory_space<vmem>>, vector<8x128xf32>
      %c0_9 = arith.constant 0 : index
      %c0_10 = arith.constant 0 : index
      %17 = vector.load %arg4[%c0_9, %c0_10] : memref<8x128xf32, #tpu.memory_space<vmem>>, vector<8x128xf32>
      %cst = arith.constant 0.000000e+00 : f32
      %18 = vector.broadcast %cst : f32 to vector<8x128xf32>
      %19 = arith.subf %18, %16 : vector<8x128xf32>
      %cst_11 = arith.constant 0.000000e+00 : f32
      %20 = vector.broadcast %cst_11 : f32 to vector<8x128xf32>
      %21 = arith.minimumf %19, %20 : vector<8x128xf32>
      %22 = math.absf %19 : vector<8x128xf32>
      %cst_12 = arith.constant 0.000000e+00 : f32
      %23 = vector.broadcast %cst_12 : f32 to vector<8x128xf32>
      %24 = arith.subf %23, %22 : vector<8x128xf32>
      %25 = math.exp %24 : vector<8x128xf32>
      %26 = math.log1p %25 : vector<8x128xf32>
      %27 = arith.subf %21, %26 : vector<8x128xf32>
      %28 = arith.addf %17, %27 : vector<8x128xf32>
      %c0_13 = arith.constant 0 : index
      %c0_14 = arith.constant 0 : index
      %29 = vector.load %arg4[%c0_13, %c0_14] : memref<8x128xf32, #tpu.memory_space<vmem>>, vector<8x128xf32>
      tpu.vector_store %arg4[%c0_13, %c0_14], %28 {strides = array<i32>} : memref<8x128xf32, #tpu.memory_space<vmem>>, vector<8x128xf32>,
    } else {
    }
    %c8_i32_4 = arith.constant 8 : i32
    %10 = arith.cmpi slt, %6, %c8_i32_4 : i32
    %11 = arith.extui %10 : i1 to i32
    %c0_i32_5 = arith.constant 0 : i32
    %12 = arith.cmpi ne, %11, %c0_i32_5 : i32
    scf.if %12 {
      %c0 = arith.constant 0 : index
      %c0_8 = arith.constant 0 : index
      %16 = vector.load %arg2[%c0, %c0_8] : memref<8x128xf32, #tpu.memory_space<vmem>>, vector<8x128xf32>
      %17 = tpu.iota {dimensions = array<i32: 0>} : vector<8x128xi32>
      %18 = vector.broadcast %6 : i32 to vector<8x128xi32>
      %19 = arith.cmpi slt, %17, %18 : vector<8x128xi32>
      %cst = arith.constant 0.000000e+00 : f32
      %20 = vector.broadcast %cst : f32 to vector<8x128xf32>
      %21 = arith.select %19, %16, %20 : vector<8x128xi1>, vector<8x128xf32>
      %cst_9 = arith.constant 0.000000e+00 : f32
      %22 = vector.broadcast %cst_9 : f32 to vector<8x128xf32>
      %23 = arith.subf %22, %21 : vector<8x128xf32>
      %cst_10 = arith.constant 0.000000e+00 : f32
      %24 = vector.broadcast %cst_10 : f32 to vector<8x128xf32>
      %25 = arith.minimumf %23, %24 : vector<8x128xf32>
      %26 = math.absf %23 : vector<8x128xf32>
      %cst_11 = arith.constant 0.000000e+00 : f32
      %27 = vector.broadcast %cst_11 : f32 to vector<8x128xf32>
      %28 = arith.subf %27, %26 : vector<8x128xf32>
      %29 = math.exp %28 : vector<8x128xf32>
      %30 = math.log1p %29 : vector<8x128xf32>
      %31 = arith.subf %25, %30 : vector<8x128xf32>
      %cst_12 = arith.constant 0.000000e+00 : f32
      %32 = vector.broadcast %cst_12 : f32 to vector<8x128xf32>
      %33 = arith.select %19, %31, %32 : vector<8x128xi1>, vector<8x128xf32>
      %c0_13 = arith.constant 0 : index
      %c0_14 = arith.constant 0 : index
      %34 = vector.load %arg4[%c0_13, %c0_14] : memref<8x128xf32, #tpu.memory_space<vmem>>, vector<8x128xf32>
      %35 = arith.addf %34, %33 : vector<8x128xf32>
      %c0_15 = arith.constant 0 : index
      %c0_16 = arith.constant 0 : index
      %36 = vector.load %arg4[%c0_15, %c0_16] : memref<8x128xf32, #tpu.memory_space<vmem>>, vector<8x128xf32>
      tpu.vector_store %arg4[%c0_15, %c0_16], %35 {strides = array<i32>} : memref<8x128xf32, #tpu.memory_space<vmem>>, vector<8x128xf32>,
    } else {
    }
    %c0_i32_6 = arith.constant 0 : i32
    %13 = arith.cmpi eq, %arg1, %c0_i32_6 : i32
    %14 = arith.extui %13 : i1 to i32
    %c0_i32_7 = arith.constant 0 : i32
    %15 = arith.cmpi ne, %14, %c0_i32_7 : i32
    scf.if %15 {
      %c0 = arith.constant 0 : index
      %c0_8 = arith.constant 0 : index
      %16 = vector.load %arg4[%c0, %c0_8] : memref<8x128xf32, #tpu.memory_space<vmem>>, vector<8x128xf32>
      %17 = vector.shape_cast %16 : vector<8x128xf32> to vector<1x8x128xf32>
      %c0_9 = arith.constant 0 : index
      %c0_10 = arith.constant 0 : index
      %c0_11 = arith.constant 0 : index
      %18 = vector.load %arg3[%c0_9, %c0_10, %c0_11] : memref<1x8x128xf32, #tpu.memory_space<vmem>>, vector<1x8x128xf32>
      tpu.vector_store %arg3[%c0_9, %c0_10, %c0_11], %17 {strides = array<i32>} : memref<1x8x128xf32, #tpu.memory_space<vmem>>, vector<1x8x128xf32>,
    } else {
    }
    return
  }
  func.func @transform_0(%arg0: i32, %arg1: i32) -> (i32, i32) {
    %c1_i32 = arith.constant 1 : i32
    %0 = arith.muli %arg0, %c1_i32 : i32
    %1 = arith.addi %0, %arg1 : i32
    %c0_i32 = arith.constant 0 : i32
    %2 = arith.minsi %1, %c0_i32 : i32
    %c0_i32_0 = arith.constant 0 : i32
    %c0_i32_1 = arith.constant 0 : i32
    return %2, %c0_i32_0 : i32, i32
  }
  func.func @transform_1(%arg0: i32, %arg1: i32) -> (i32, i32, i32) {
    %c0_i32 = arith.constant 0 : i32
    %c0_i32_0 = arith.constant 0 : i32
    %c0_i32_1 = arith.constant 0 : i32
    return %arg0, %c0_i32, %c0_i32_0 : i32, i32, i32
  }
}

</mosaic_0001>

<bundles_post_ra>
// kernel: tpu_custom_call.1
= control target key start
LH: loop header
LB: loop body
LE: loop exit
PB: predicated region body
PF: predicated region fallthrough
CT: control target
= control target key end

     0   :  { %6 = vsyncpa [#allocation4], 0  ;;  %s206_s0 = inlined_call_operand.hbm [shape: f32[1,128], index: 0, kind: input, shape index: {}]   ;;  %s207_s1 = inlined_call_operand.hbm [shape: f32[1,8,128], index: 1, kind: output, shape index: {}]  }
   0x1   :  { %7 = vsyncpa [#allocation5], 0 }
   0x2   :  { %17 = vsyncadd [#allocation4], 112  ;;  %s20_s8 = sshll.u32 %s206_s0, 4  ;;  %s184_s9 = smov [#allocation3]   ;;  %s21_s8 = int_to_ptr.hbm [resolvable:$true] %s20_s8 }
   0x3   :  { %s22_s10 = sshll.u32 %s184_s9, 4  ;;  %s185_s11 = smov 16   ;;  %s23_s10 = int_to_ptr.vmem [resolvable:$true] %s22_s10 }
   0x4   :  { %s186_s12 = smov 1  }
   0x5   :  { %28 = dma.hbm_to_vmem [thread:$0]  %s21_s8, 16, %s23_s10, [#allocation4], %s185_s11, %s185_s11, %s186_s12  }
   0x6   :  { %180 = dma.done.wait [#allocation4], 128  }
   0x7   :  { %181 = vsyncadd [#allocation4], 4294967168  ;;  %v75_v0 = vlaneseq  ;;  %v74_v2 = vld [vmem:[#allocation3] sm:$0xff]  ;;  %s187_s0 = smov [#allocation6]   ;;  %s112_s16 = sshll.u32 %s207_s1, 4  ;;  %s113_s16 = int_to_ptr.hbm [resolvable:$true] %s112_s16 }
   0x8   :  { %s110_s13 = sshll.u32 %s187_s0, 4  ;;  %s111_s13 = int_to_ptr.vmem [resolvable:$true] %s110_s13 }
   0x9   :  { %v76_v1 = vshrl.u32 %v75_v0, 7 }
   0xb   :  { %vm78_vm0 = vcmp.lt.s32.totalorder %v76_v1, 1 }
   0xc   :  { %v79_v3 = vsel %vm78_vm0, %v74_v2, 0.0 }
   0xd   :  { %v80_v4 = vsub.f32 0.0, %v79_v3 }
   0xf   :  { %v82_v5 = vand.u32 2147483647, %v80_v4  ;;  %v81_v15 = vmin.f32 %v80_v4, 0.0 }
  0x11   :  { %v83_v6 = vsub.f32 0.0, %v82_v5 }
  0x13   :  { %v84_v7 = vmul.f32 1.442695, %v83_v6 }
  0x15   :  { %128 = vpow2.f32 %v84_v7 }
  0x1b   :  { %v129_v8 = vpop.eup %128 }
  0x1c   :  { %v86_v9 = vadd.f32 1.0, %v129_v8  ;;  %v89_v10 = vmul.f32 -0.5, %v129_v8  ;;  %v92_v12 = vand.u32 2147483647, %v129_v8 }
  0x1e   :  { %130 = vlog2.f32 %v86_v9  ;;  %v90_v11 = vadd.f32 1.0, %v89_v10  ;;  %vm93_vm1 = vcmp.lt.f32.partialorder %v92_v12, 0.0004427343 }
  0x20   :  { %v91_v13 = vmul.f32 %v129_v8, %v90_v11 }
  0x24   :  { %v131_v14 = vpop.eup %130 }
  0x25   :  { %v88_v16 = vmul.f32 0.6931472, %v131_v14 }
  0x27   :  { %v94_v17 = vsel %vm93_vm1, %v91_v13, %v88_v16 }
  0x28   :  { %v95_v18 = vsub.f32 %v81_v15, %v94_v17 }
  0x2a   :  { %v96_v19 = vsel %vm78_vm0, %v95_v18, 0.0 }
  0x2b   :  { %104 = vst [vmem:[#allocation6] sm:$0xff] %v96_v19 }
  0x2c   :  { %115 = dma.vmem_to_hbm [thread:$0]  %s111_s13, 128, %s113_s16, [#allocation5]  }
  0x2d   :  { %182 = dma.done.wait [#allocation5], 128  }
  0x2e   :  { %183 = vsyncadd [#allocation5], 4294967168 }
  0x2f   :  { %120 = vsyncpa [#allocation4], 1 }
  0x30   :  { %121 = vsyncpa [#allocation5], 1 }

</bundles_post_ra>
